<compile_context>
chip_gen: v5e
topology: v5e:2x2
jax: 0.10.0
libtpu: 0.0.40
codegen_flags: <defaults>
</compile_context>

<pallas_src>
import functools

import jax
import jax.numpy as jnp
from jax.experimental import pallas as pl
from jax.experimental.pallas import tpu as pltpu

_MXU_DTYPE = jnp.bfloat16   # MXU operand dtype (f32 accumulation)


def _attention_kernel(hidden_ref, context_ref, wht_ref, wct_ref, wv_ref, bv_ref,
                      wctx_ref, score_ref,
                      hlin_sc, m_sc, l_sc, acc_sc, *, total_s):
    # Grid = (batch tiles, sequence chunks); the sequence axis is the fast,
    # "arbitrary" reduction axis.
    s_idx = pl.program_id(1)
    n_s = pl.num_programs(1)

    ctx = context_ref[...]                       # (TB, TS, D), input dtype
    tb, ts, d = ctx.shape

    # ---- once per batch tile: h_lin = hidden @ Wh^T and accumulator init ----
    @pl.when(s_idx == 0)
    def _():
        h = hidden_ref[...].astype(_MXU_DTYPE)
        hlin_sc[...] = jnp.dot(h, wht_ref[...],
                               preferred_element_type=jnp.float32)
        m_sc[...] = jnp.full(m_sc.shape, -jnp.inf, dtype=m_sc.dtype)
        l_sc[...] = jnp.zeros(l_sc.shape, dtype=l_sc.dtype)
        acc_sc[...] = jnp.zeros(acc_sc.shape, dtype=acc_sc.dtype)

    # ---- c_lin chunk: one flattened (TB*TS, D) x (D, D) bf16 MXU matmul -----
    c_lin = jnp.dot(ctx.reshape(tb * ts, d).astype(_MXU_DTYPE), wct_ref[...],
                    preferred_element_type=jnp.float32).reshape(tb, ts, d)

    # tanh(h_lin + c_lin); kept in f32 on the VPU/EUP for accuracy.
    non_lin = jnp.tanh(hlin_sc[...][:, None, :] + c_lin)        # (TB, TS, D)

    # score = non_lin @ Wv^T + bv.  N=1 output -> VPU multiply + XLU lane
    # reduce instead of a degenerate MXU matmul.
    wv = wv_ref[...].reshape(1, 1, d).astype(jnp.float32)
    score = jnp.sum(non_lin * wv, axis=-1) + bv_ref[0, 0]       # (TB, TS) f32

    # Mask padded tail columns when S is not a multiple of the chunk size
    # (static condition -> no cost when the chunking is exact).
    ragged = (total_s % ts) != 0
    if ragged:
        col = jax.lax.broadcasted_iota(jnp.int32, score.shape, 1) + s_idx * ts
        valid = col < total_s
        score = jnp.where(valid, score, -jnp.inf)

    # Raw scores out (softmaxed for the returned weights in the wrapper).
    score_ref[...] = score

    # ---- online softmax update of the weighted-context accumulator ----------
    m_prev = m_sc[...]
    m_new = jnp.maximum(m_prev, jnp.max(score, axis=-1, keepdims=True))
    corr = jnp.exp(m_prev - m_new)                              # (TB, 1)
    p = jnp.exp(score - m_new)                                  # (TB, TS)
    l_sc[...] = corr * l_sc[...] + jnp.sum(p, axis=-1, keepdims=True)

    contrib = p[:, :, None] * ctx                               # promoted to f32
    if ragged:
        contrib = jnp.where(valid[:, :, None], contrib, 0.0)
    acc_sc[...] = corr * acc_sc[...] + jnp.sum(contrib, axis=1)
    m_sc[...] = m_new

    # ---- last chunk: exact normalisation and writeback ----------------------
    @pl.when(s_idx == n_s - 1)
    def _():
        inv_l = 1.0 / l_sc[...]                                 # exact, (TB, 1)
        wctx_ref[...] = (acc_sc[...] * inv_l).astype(wctx_ref.dtype)


def _vmem_limit_bytes():
    """Per-generation VMEM request: big on 128 MiB parts, headroom on v7x (64 MiB)."""
    try:
        cap = int(pltpu.get_tpu_info().vmem_capacity_bytes)
        if cap <= 0:
            cap = 64 * 2**20
    except Exception:
        cap = 64 * 2**20            # conservative fallback: smallest generation
    return int(max(32 * 2**20, min(int(cap * 0.75), cap - 16 * 2**20)))


def _pick_tiles(B, S, D, D_in, itemsize, budget):
    """Pick (batch tile TB, sequence chunk TS).

    TS: full S when modest, else 512-wide chunks (multiple of 8 so the
    (TB*TS, D) reshape stays a free relayout).  TB: largest multiple of 8 that
    fits the VMEM budget, capped so the batch grid keeps >= ~4 steps for
    megacore sharding + pipelining; for B <= 8 the whole batch is one tile
    (block dims must be a multiple of 8 or the full array extent).
    """
    TS = S if S <= 512 else 512

    def bytes_per_row(ts):
        # double-buffered context chunk + ~3 f32 chunk intermediates
        # + bf16 operand copy + per-row scratch/output rows.
        return ts * D * (2 * itemsize + 14) + (2 * D + D_in) * 8 + ts * 8

    if B <= 8:
        TB = B
    else:
        tb_mem = max(8, int(budget // bytes_per_row(TS)) // 8 * 8)
        tb_par = max(8, ((-(-B // 4)) + 7) // 8 * 8)   # ~B/4 -> >= ~4 batch steps
        TB = min(tb_mem, tb_par, max(8, (B // 8) * 8))

    # If a single (TB, TS, D) chunk still blows the budget, shrink the chunk.
    while TS > 8 and TB * bytes_per_row(TS) > budget:
        TS = max(8, ((TS // 2) + 7) // 8 * 8)
    return TB, TS


def attention_xiao(hidden, context, wh, wc, wv, bv):
    """Additive attention.  Weights in PyTorch (out_features, in_features) layout.

    Returns (weightedContext (B, D), weight (B, 1, S)) like the torch module.
    """
    B, S, D = context.shape
    D_in = hidden.shape[-1]
    itemsize = jnp.dtype(hidden.dtype).itemsize

    vmem_limit = _vmem_limit_bytes()
    # Reserve room for the resident (double-buffered) bf16 weight blocks.
    weight_bytes = 4 * (D_in * D + D * D + D)
    tile_budget = max(vmem_limit // 2 - weight_bytes, vmem_limit // 8)
    TB, TS = _pick_tiles(B, S, D, D_in, itemsize, tile_budget)
    grid = (pl.cdiv(B, TB), pl.cdiv(S, TS))

    # Pre-transpose weights (free XLA layout work) and cast MXU operands to
    # bf16; bias goes through SMEM as a scalar.
    wh_t = jnp.asarray(wh).T.astype(_MXU_DTYPE)                 # (D_in, D)
    wc_t = jnp.asarray(wc).T.astype(_MXU_DTYPE)                 # (D, D)
    wv2 = jnp.asarray(wv).reshape(1, D).astype(jnp.float32)     # (1, D)
    bv2 = jnp.asarray(bv).reshape(1, 1).astype(jnp.float32)     # (1, 1)

    kernel = functools.partial(_attention_kernel, total_s=S)

    wctx, scores = pl.pallas_call(
        kernel,
        out_shape=(
            jax.ShapeDtypeStruct((B, D), hidden.dtype),   # weightedContext
            jax.ShapeDtypeStruct((B, S), jnp.float32),    # raw attention scores
        ),
        grid=grid,
        in_specs=[
            pl.BlockSpec((TB, D_in), lambda b, s: (b, 0)),        # hidden tile
            pl.BlockSpec((TB, TS, D), lambda b, s: (b, s, 0)),    # context chunk
            pl.BlockSpec((D_in, D), lambda b, s: (0, 0)),         # Wh^T (resident)
            pl.BlockSpec((D, D), lambda b, s: (0, 0)),            # Wc^T (resident)
            pl.BlockSpec((1, D), lambda b, s: (0, 0)),            # Wv row
            pl.BlockSpec(memory_space=pltpu.MemorySpace.SMEM),    # bias scalar
        ],
        out_specs=(
            pl.BlockSpec((TB, D), lambda b, s: (b, 0)),    # resident across s
            pl.BlockSpec((TB, TS), lambda b, s: (b, s)),   # per-chunk scores
        ),
        scratch_shapes=[
            pltpu.VMEM((TB, D), jnp.float32),    # h_lin (computed once per b tile)
            pltpu.VMEM((TB, 1), jnp.float32),    # running max
            pltpu.VMEM((TB, 1), jnp.float32),    # running sum
            pltpu.VMEM((TB, D), jnp.float32),    # weighted-context accumulator
        ],
        compiler_params=pltpu.CompilerParams(
            dimension_semantics=("parallel", "arbitrary"),
            vmem_limit_bytes=vmem_limit,
        ),
    )(hidden, context, wh_t, wc_t, wv2, bv2)

    # Cheap (B, S) epilogue: exact softmax for the returned attention weights.
    weight = jax.nn.softmax(scores, axis=-1).astype(hidden.dtype)
    return wctx, weight[:, None, :]      # match torch's unsqueeze(1)


def reference(hidden, context, wh, wc, wv, bv):
    h_lin = hidden @ wh.T
    c_lin = jnp.einsum('bsd,ed->bse', context, wc)
    non_lin = jnp.tanh(h_lin[:, None, :] + c_lin)
    score = jnp.einsum('bsd,od->bso', non_lin, wv)[..., 0] + bv[0, 0]
    w = jax.nn.softmax(score, axis=-1)
    wctx = jnp.einsum('bs,bsd->bd', w, context)
    return wctx, w[:, None, :]


if __name__ == "__main__":
    B, S = 2, 8
    hidden_size = 32
    input_size = 32

    key = jax.random.PRNGKey(0)
    k0, k1, k2, k3, k4, k5 = jax.random.split(key, 6)

    hidden = jax.random.normal(k0, (B, input_size), dtype=jnp.float32)
    context = jax.random.normal(k1, (B, S, hidden_size), dtype=jnp.float32)

    # PyTorch weight shapes: (out_features, in_features)
    wh = 0.1 * jax.random.normal(k2, (hidden_size, input_size), dtype=jnp.float32)   # linear_h
    wc = 0.1 * jax.random.normal(k3, (hidden_size, hidden_size), dtype=jnp.float32)  # linear_context
    wv = 0.1 * jax.random.normal(k4, (1, hidden_size), dtype=jnp.float32)            # linear_V.weight
    bv = 0.1 * jax.random.normal(k5, (1, 1), dtype=jnp.float32)                      # linear_V.bias

    wctx, weight = attention_xiao(hidden, context, wh, wc, wv, bv)
    jax.block_until_ready((wctx, weight))

    ref_wctx, ref_weight = reference(hidden, context, wh, wc, wv, bv)
    assert wctx.shape == (B, hidden_size)
    assert weight.shape == (B, 1, S)
    # Attention weights are exactly normalised (exact softmax, no approx recip).
    assert jnp.allclose(jnp.sum(weight, axis=-1), 1.0, atol=1e-5)
    # bf16 MXU operands (with f32 accumulation) introduce ~1e-3 error in the
    # scores, so the tolerance is loosened vs. a pure-f32 implementation.
    assert jnp.allclose(wctx, ref_wctx, atol=2e-2, rtol=2e-2)
    assert jnp.allclose(weight, ref_weight, atol=2e-2, rtol=2e-2)

    print("KERNEL_OK")
</pallas_src>

<mosaic_0001>
module attributes {stable_mosaic.version = 11 : i64} {
  func.func @_attention_kernel(%arg0: i32, %arg1: i32, %arg2: memref<2x32xf32, #tpu.memory_space<vmem>>, %arg3: memref<2x8x32xf32, #tpu.memory_space<vmem>>, %arg4: memref<32x32xbf16, #tpu.memory_space<vmem>>, %arg5: memref<32x32xbf16, #tpu.memory_space<vmem>>, %arg6: memref<1x32xf32, #tpu.memory_space<vmem>>, %arg7: memref<1x1xf32, #tpu.memory_space<smem>>, %arg8: memref<2x32xf32, #tpu.memory_space<vmem>>, %arg9: memref<2x8xf32, #tpu.memory_space<vmem>>, %arg10: memref<2x32xf32, #tpu.memory_space<vmem>>, %arg11: memref<2x1xf32, #tpu.memory_space<vmem>>, %arg12: memref<2x1xf32, #tpu.memory_space<vmem>>, %arg13: memref<2x32xf32, #tpu.memory_space<vmem>>) attributes {dimension_semantics = [#tpu.dimension_semantics<parallel>, #tpu.dimension_semantics<arbitrary>], iteration_bounds = array<i64: 1, 1>, scalar_prefetch = 0 : i64, scratch_operands = 4 : i64, tpu.core_type = #tpu.core_type<tc>, window_params = [{transform_indices = @transform_0, window_bounds = array<i64: 2, 32>}, {transform_indices = @transform_1, window_bounds = array<i64: 2, 8, 32>}, {pipeline_mode = #tpu.pipeline_mode<synchronous>, transform_indices = @transform_2, window_bounds = array<i64: 32, 32>}, {pipeline_mode = #tpu.pipeline_mode<synchronous>, transform_indices = @transform_3, window_bounds = array<i64: 32, 32>}, {pipeline_mode = #tpu.pipeline_mode<synchronous>, transform_indices = @transform_4, window_bounds = array<i64: 1, 32>}, {transform_indices = @transform_5, window_bounds = array<i64: 1, 1>}, {transform_indices = @transform_6, window_bounds = array<i64: 2, 32>}, {transform_indices = @transform_7, window_bounds = array<i64: 2, 8>}]} {
    %c0 = arith.constant 0 : index
    %c0_0 = arith.constant 0 : index
    %c0_1 = arith.constant 0 : index
    %0 = vector.load %arg3[%c0, %c0_0, %c0_1] : memref<2x8x32xf32, #tpu.memory_space<vmem>>, vector<2x8x32xf32>
    %c0_i32 = arith.constant 0 : i32
    %1 = arith.cmpi eq, %arg1, %c0_i32 : i32
    %2 = arith.extui %1 : i1 to i32
    %c0_i32_2 = arith.constant 0 : i32
    %3 = arith.cmpi ne, %2, %c0_i32_2 : i32
    scf.if %3 {
      %c0_31 = arith.constant 0 : index
      %c0_32 = arith.constant 0 : index
      %51 = vector.load %arg2[%c0_31, %c0_32] : memref<2x32xf32, #tpu.memory_space<vmem>>, vector<2x32xf32>
      %52 = arith.truncf %51 : vector<2x32xf32> to vector<2x32xbf16>
      %c0_33 = arith.constant 0 : index
      %c0_34 = arith.constant 0 : index
      %53 = vector.load %arg4[%c0_33, %c0_34] : memref<32x32xbf16, #tpu.memory_space<vmem>>, vector<32x32xbf16>
      %cst_35 = arith.constant dense<0.000000e+00> : vector<2x32xf32>
      %54 = tpu.matmul %52, %53, %cst_35 {dimension_numbers = #tpu.dot_dimension_numbers<[1], [0], [0], [1], [0, 0, 1, 1], [], []>} : vector<2x32xbf16>, vector<32x32xbf16>, vector<2x32xf32> -> vector<2x32xf32>
      %c0_36 = arith.constant 0 : index
      %c0_37 = arith.constant 0 : index
      %55 = vector.load %arg10[%c0_36, %c0_37] : memref<2x32xf32, #tpu.memory_space<vmem>>, vector<2x32xf32>
      tpu.vector_store %arg10[%c0_36, %c0_37], %54 {strides = array<i32>} : memref<2x32xf32, #tpu.memory_space<vmem>>, vector<2x32xf32>,
      %cst_38 = arith.constant 0xFF800000 : f32
      %56 = vector.broadcast %cst_38 : f32 to vector<2x1xf32>
      %c0_39 = arith.constant 0 : index
      %c0_40 = arith.constant 0 : index
      %57 = vector.load %arg11[%c0_39, %c0_40] : memref<2x1xf32, #tpu.memory_space<vmem>>, vector<2x1xf32>
      tpu.vector_store %arg11[%c0_39, %c0_40], %56 {strides = array<i32>} : memref<2x1xf32, #tpu.memory_space<vmem>>, vector<2x1xf32>,
      %cst_41 = arith.constant 0.000000e+00 : f32
      %58 = vector.broadcast %cst_41 : f32 to vector<2x1xf32>
      %c0_42 = arith.constant 0 : index
      %c0_43 = arith.constant 0 : index
      %59 = vector.load %arg12[%c0_42, %c0_43] : memref<2x1xf32, #tpu.memory_space<vmem>>, vector<2x1xf32>
      tpu.vector_store %arg12[%c0_42, %c0_43], %58 {strides = array<i32>} : memref<2x1xf32, #tpu.memory_space<vmem>>, vector<2x1xf32>,
      %cst_44 = arith.constant 0.000000e+00 : f32
      %60 = vector.broadcast %cst_44 : f32 to vector<2x32xf32>
      %c0_45 = arith.constant 0 : index
      %c0_46 = arith.constant 0 : index
      %61 = vector.load %arg13[%c0_45, %c0_46] : memref<2x32xf32, #tpu.memory_space<vmem>>, vector<2x32xf32>
      tpu.vector_store %arg13[%c0_45, %c0_46], %60 {strides = array<i32>} : memref<2x32xf32, #tpu.memory_space<vmem>>, vector<2x32xf32>,
    } else {
    }
    %4 = vector.shape_cast %0 : vector<2x8x32xf32> to vector<16x32xf32>
    %5 = arith.truncf %4 : vector<16x32xf32> to vector<16x32xbf16>
    %c0_3 = arith.constant 0 : index
    %c0_4 = arith.constant 0 : index
    %6 = vector.load %arg5[%c0_3, %c0_4] : memref<32x32xbf16, #tpu.memory_space<vmem>>, vector<32x32xbf16>
    %cst = arith.constant dense<0.000000e+00> : vector<16x32xf32>
    %7 = tpu.matmul %5, %6, %cst {dimension_numbers = #tpu.dot_dimension_numbers<[1], [0], [0], [1], [0, 0, 1, 1], [], []>} : vector<16x32xbf16>, vector<32x32xbf16>, vector<16x32xf32> -> vector<16x32xf32>
    %8 = vector.shape_cast %7 : vector<16x32xf32> to vector<2x8x32xf32>
    %c0_5 = arith.constant 0 : index
    %c0_6 = arith.constant 0 : index
    %9 = vector.load %arg10[%c0_5, %c0_6] : memref<2x32xf32, #tpu.memory_space<vmem>>, vector<2x32xf32>
    %10 = vector.shape_cast %9 : vector<2x32xf32> to vector<2x1x32xf32>
    %11 = vector.broadcast %10 : vector<2x1x32xf32> to vector<2x8x32xf32>
    %12 = arith.addf %11, %8 : vector<2x8x32xf32>
    %13 = math.tanh %12 : vector<2x8x32xf32>
    %c0_7 = arith.constant 0 : index
    %c0_8 = arith.constant 0 : index
    %14 = vector.load %arg6[%c0_7, %c0_8] : memref<1x32xf32, #tpu.memory_space<vmem>>, vector<1x32xf32>
    %15 = vector.shape_cast %14 : vector<1x32xf32> to vector<1x1x32xf32>
    %16 = vector.broadcast %15 : vector<1x1x32xf32> to vector<2x8x32xf32>
    %17 = arith.mulf %13, %16 : vector<2x8x32xf32>
    %cst_9 = arith.constant dense<0.000000e+00> : vector<2x8xf32>
    %18 = vector.multi_reduction <add>, %17, %cst_9 [2] : vector<2x8x32xf32> to vector<2x8xf32>
    %c0_10 = arith.constant 0 : index
    %c0_11 = arith.constant 0 : index
    %19 = memref.load %arg7[%c0_10, %c0_11] : memref<1x1xf32, #tpu.memory_space<smem>>
    %20 = vector.broadcast %19 : f32 to vector<2x8xf32>
    %21 = arith.addf %18, %20 : vector<2x8xf32>
    %c0_12 = arith.constant 0 : index
    %c0_13 = arith.constant 0 : index
    %22 = vector.load %arg9[%c0_12, %c0_13] : memref<2x8xf32, #tpu.memory_space<vmem>>, vector<2x8xf32>
    tpu.vector_store %arg9[%c0_12, %c0_13], %21 {strides = array<i32>} : memref<2x8xf32, #tpu.memory_space<vmem>>, vector<2x8xf32>,
    %c0_14 = arith.constant 0 : index
    %c0_15 = arith.constant 0 : index
    %23 = vector.load %arg11[%c0_14, %c0_15] : memref<2x1xf32, #tpu.memory_space<vmem>>, vector<2x1xf32>
    %cst_16 = arith.constant dense<0xFF800000> : vector<2xf32>
    %24 = vector.multi_reduction <maximumf>, %21, %cst_16 [1] : vector<2x8xf32> to vector<2xf32>
    %25 = vector.shape_cast %24 : vector<2xf32> to vector<2x1xf32>
    %26 = arith.maximumf %23, %25 : vector<2x1xf32>
    %27 = arith.subf %23, %26 : vector<2x1xf32>
    %28 = math.exp %27 : vector<2x1xf32>
    %29 = vector.broadcast %26 : vector<2x1xf32> to vector<2x8xf32>
    %30 = arith.subf %21, %29 : vector<2x8xf32>
    %31 = math.exp %30 : vector<2x8xf32>
    %c0_17 = arith.constant 0 : index
    %c0_18 = arith.constant 0 : index
    %32 = vector.load %arg12[%c0_17, %c0_18] : memref<2x1xf32, #tpu.memory_space<vmem>>, vector<2x1xf32>
    %33 = arith.mulf %28, %32 : vector<2x1xf32>
    %cst_19 = arith.constant dense<0.000000e+00> : vector<2xf32>
    %34 = vector.multi_reduction <add>, %31, %cst_19 [1] : vector<2x8xf32> to vector<2xf32>
    %35 = vector.shape_cast %34 : vector<2xf32> to vector<2x1xf32>
    %36 = arith.addf %33, %35 : vector<2x1xf32>
    %c0_20 = arith.constant 0 : index
    %c0_21 = arith.constant 0 : index
    %37 = vector.load %arg12[%c0_20, %c0_21] : memref<2x1xf32, #tpu.memory_space<vmem>>, vector<2x1xf32>
    tpu.vector_store %arg12[%c0_20, %c0_21], %36 {strides = array<i32>} : memref<2x1xf32, #tpu.memory_space<vmem>>, vector<2x1xf32>,
    %38 = vector.shape_cast %31 : vector<2x8xf32> to vector<2x8x1xf32>
    %39 = vector.broadcast %38 : vector<2x8x1xf32> to vector<2x8x32xf32>
    %40 = arith.mulf %39, %0 : vector<2x8x32xf32>
    %c0_22 = arith.constant 0 : index
    %c0_23 = arith.constant 0 : index
    %41 = vector.load %arg13[%c0_22, %c0_23] : memref<2x32xf32, #tpu.memory_space<vmem>>, vector<2x32xf32>
    %42 = vector.broadcast %28 : vector<2x1xf32> to vector<2x32xf32>
    %43 = arith.mulf %42, %41 : vector<2x32xf32>
    %cst_24 = arith.constant dense<0.000000e+00> : vector<2x32xf32>
    %44 = vector.multi_reduction <add>, %40, %cst_24 [1] : vector<2x8x32xf32> to vector<2x32xf32>
    %45 = arith.addf %43, %44 : vector<2x32xf32>
    %c0_25 = arith.constant 0 : index
    %c0_26 = arith.constant 0 : index
    %46 = vector.load %arg13[%c0_25, %c0_26] : memref<2x32xf32, #tpu.memory_space<vmem>>, vector<2x32xf32>
    tpu.vector_store %arg13[%c0_25, %c0_26], %45 {strides = array<i32>} : memref<2x32xf32, #tpu.memory_space<vmem>>, vector<2x32xf32>,
    %c0_27 = arith.constant 0 : index
    %c0_28 = arith.constant 0 : index
    %47 = vector.load %arg11[%c0_27, %c0_28] : memref<2x1xf32, #tpu.memory_space<vmem>>, vector<2x1xf32>
    tpu.vector_store %arg11[%c0_27, %c0_28], %26 {strides = array<i32>} : memref<2x1xf32, #tpu.memory_space<vmem>>, vector<2x1xf32>,
    %c0_i32_29 = arith.constant 0 : i32
    %48 = arith.cmpi eq, %arg1, %c0_i32_29 : i32
    %49 = arith.extui %48 : i1 to i32
    %c0_i32_30 = arith.constant 0 : i32
    %50 = arith.cmpi ne, %49, %c0_i32_30 : i32
    scf.if %50 {
      %c0_31 = arith.constant 0 : index
      %c0_32 = arith.constant 0 : index
      %51 = vector.load %arg12[%c0_31, %c0_32] : memref<2x1xf32, #tpu.memory_space<vmem>>, vector<2x1xf32>
      %cst_33 = arith.constant 1.000000e+00 : f32
      %52 = vector.broadcast %cst_33 : f32 to vector<2x1xf32>
      %53 = arith.divf %52, %51 : vector<2x1xf32>
      %c0_34 = arith.constant 0 : index
      %c0_35 = arith.constant 0 : index
      %54 = vector.load %arg13[%c0_34, %c0_35] : memref<2x32xf32, #tpu.memory_space<vmem>>, vector<2x32xf32>
      %55 = vector.broadcast %53 : vector<2x1xf32> to vector<2x32xf32>
      %56 = arith.mulf %54, %55 : vector<2x32xf32>
      %c0_36 = arith.constant 0 : index
      %c0_37 = arith.constant 0 : index
      %57 = vector.load %arg8[%c0_36, %c0_37] : memref<2x32xf32, #tpu.memory_space<vmem>>, vector<2x32xf32>
      tpu.vector_store %arg8[%c0_36, %c0_37], %56 {strides = array<i32>} : memref<2x32xf32, #tpu.memory_space<vmem>>, vector<2x32xf32>,
    } else {
    }
    return
  }
  func.func @transform_0(%arg0: i32, %arg1: i32) -> (i32, i32) {
    %c0_i32 = arith.constant 0 : i32
    %c0_i32_0 = arith.constant 0 : i32
    return %arg0, %c0_i32 : i32, i32
  }
  func.func @transform_1(%arg0: i32, %arg1: i32) -> (i32, i32, i32) {
    %c0_i32 = arith.constant 0 : i32
    %c0_i32_0 = arith.constant 0 : i32
    return %arg0, %arg1, %c0_i32 : i32, i32, i32
  }
  func.func @transform_2(%arg0: i32, %arg1: i32) -> (i32, i32) {
    %c0_i32 = arith.constant 0 : i32
    %c0_i32_0 = arith.constant 0 : i32
    %c0_i32_1 = arith.constant 0 : i32
    return %c0_i32, %c0_i32_0 : i32, i32
  }
  func.func @transform_3(%arg0: i32, %arg1: i32) -> (i32, i32) {
    %c0_i32 = arith.constant 0 : i32
    %c0_i32_0 = arith.constant 0 : i32
    %c0_i32_1 = arith.constant 0 : i32
    return %c0_i32, %c0_i32_0 : i32, i32
  }
  func.func @transform_4(%arg0: i32, %arg1: i32) -> (i32, i32) {
    %c0_i32 = arith.constant 0 : i32
    %c0_i32_0 = arith.constant 0 : i32
    %c0_i32_1 = arith.constant 0 : i32
    return %c0_i32, %c0_i32_0 : i32, i32
  }
  func.func @transform_5(%arg0: i32, %arg1: i32) -> (i32, i32) {
    %c0_i32 = arith.constant 0 : i32
    %c0_i32_0 = arith.constant 0 : i32
    %c0_i32_1 = arith.constant 0 : i32
    return %c0_i32, %c0_i32_0 : i32, i32
  }
  func.func @transform_6(%arg0: i32, %arg1: i32) -> (i32, i32) {
    %c0_i32 = arith.constant 0 : i32
    %c0_i32_0 = arith.constant 0 : i32
    return %arg0, %c0_i32 : i32, i32
  }
  func.func @transform_7(%arg0: i32, %arg1: i32) -> (i32, i32) {
    %c0_i32 = arith.constant 0 : i32
    return %arg0, %arg1 : i32, i32
  }
}

</mosaic_0001>

<bundles_post_ra>
// kernel: tpu_custom_call.1
= control target key start
LH: loop header
LB: loop body
LE: loop exit
PB: predicated region body
PF: predicated region fallthrough
CT: control target
= control target key end

     0   :  { %14 = vsyncpa [#allocation8], 0  ;;  %s614_s0 = inlined_call_operand.vmem [shape: f32[2,32], index: 0, kind: input, shape index: {}]   ;;  %s615_s1 = inlined_call_operand.hbm [shape: f32[2,8,32], index: 1, kind: input, shape index: {}]   ;;  %s616_s2 = inlined_call_operand.hbm [shape: bf16[32,32], index: 2, kind: input, shape index: {}]   ;;  %s617_s3 = inlined_call_operand.hbm [shape: bf16[32,32], index: 3, kind: input, shape index: {}]   ;;  %s618_s4 = inlined_call_operand.vmem [shape: f32[1,32], index: 4, kind: input, shape index: {}]   ;;  %s619_s5 = inlined_call_operand.<no memory space> [shape: f32[1,1], index: 5, kind: input, shape index: {}]   ;;  %s620_s6 = inlined_call_operand.hbm [shape: f32[2,32], index: 6, kind: output, shape index: {0}]   ;;  %s621_s7 = inlined_call_operand.hbm [shape: f32[2,8], index: 7, kind: output, shape index: {1}]  }
   0x1   :  { %15 = vsyncpa [#allocation11], 0 }
   0x2   :  { %16 = vsyncpa [#allocation9], 0  ;;  %s37_s26 = sshll.u32 %s616_s2, 4  ;;  %s38_s26 = int_to_ptr.hbm [resolvable:$true] %s37_s26 }
   0x3   :  { %17 = vsyncpa [#allocation15], 0  ;;  %s510_s27 = smov [#allocation10]   ;;  %s24_s8 = sshll.u32 %s615_s1, 4  ;;  %s25_s8 = int_to_ptr.hbm [resolvable:$true] %s24_s8 }
   0x4   :  { %s39_s28 = sshll.u32 %s510_s27, 4  ;;  %s511_s9 = smov 64   ;;  %s40_s28 = int_to_ptr.vmem [resolvable:$true] %s39_s28 }
   0x5   :  { %s512_s10 = smov 4   ;;  %s513_s11 = smov [#allocation7]  }
   0x6   :  { %45 = dma.hbm_to_vmem [thread:$0]  %s38_s26, 256, %s40_s28, [#allocation11], %s511_s9, %s511_s9, %s512_s10  }
   0x7   :  { %s26_s12 = sshll.u32 %s513_s11, 4  ;;  %s514_s13 = smov 128   ;;  %s27_s12 = int_to_ptr.vmem [resolvable:$true] %s26_s12 }
   0x8   :  { %s515_s14 = smov 8   ;;  %s50_s16 = sshll.u32 %s617_s3, 4  ;;  %s51_s16 = int_to_ptr.hbm [resolvable:$true] %s50_s16 }
   0x9   :  { %32 = dma.hbm_to_vmem [thread:$0]  %s25_s8, 256, %s27_s12, [#allocation8], %s514_s13, %s514_s13, %s515_s14  }
   0xa   :  { %s516_s17 = smov [#allocation12]  }
   0xb   :  { %s52_s18 = sshll.u32 %s516_s17, 4  ;;  %s53_s18 = int_to_ptr.vmem [resolvable:$true] %s52_s18 }
   0xc   :  { %58 = dma.hbm_to_vmem [thread:$0]  %s51_s16, 256, %s53_s18, [#allocation11], %s511_s9, %s511_s9, %s512_s10  }
   0xd   :  { %502 = dma.done.wait [#allocation8], 256  }
   0xe   :  { %503 = vsyncadd [#allocation8], 4294967040 }
   0xf   :  { %504 = dma.done.wait [#allocation11], 512  }
  0x10   :  { %505 = vsyncadd [#allocation11], 4294966784  ;;  %v351_v0 = vld [vmem:[#allocation10 + $0x8] sm:$0xff]  ;;  %v353_v1 = vld [vmem:[#allocation12 + $0x8] sm:$0xff]  ;;  %vm100_vm0 = vcmask 261120   ;;  %vm119_vm1 = vcmask 1024   ;;  %v187_v29 = vlaneseq  ;;  %v182_v30 = vstv %s619_s5 }
  0x11   :  { %v350_v2 = vld [vmem:[#allocation10] sm:$0xff]  ;;  %v352_v3 = vld [vmem:[#allocation12] sm:$0xff]  ;;  %v82_v4 = vld [vmem:[%s614_s0] sm:$0x3]  ;;  %110 = vmatpush.bf16.msra.mxu0 %v351_v0  ;;  %150 = vmatpush.bf16.msra.mxu1 %v353_v1  ;;  %vm117_vm2 = vcmask 254976   ;;  %v517_v9 = vmov 0.0  }
  0x12   :  { %v574_v5 = vld [vmem:[#allocation7] sm:$0xff]  ;;  %v576_v6 = vld [vmem:[#allocation7 + $0x8] sm:$0xff]  ;;  %v83_v7 = vpack.c.bf16 %v82_v4, %v82_v4  ;;  %121 = vst.msk [vmem:[#allocation4] sm:$0x3] %vm119_vm1, %v517_v9  ;;  %v369_v20 = vld [vmem:[%s618_s4] ss:$0 sm:$0xff] }
  0x13   :  { %v123_v8 = vpack.c.bf16 %v576_v6, %v574_v5  ;;  %122 = vst.msk [vmem:[#allocation5] sm:$0x3] %vm117_vm2, %v517_v9  ;;  %v518_v27 = vmov -inf   ;;  %v188_v31 = vand.u32 127, %v187_v29  ;;  %vm191_vm3 = vcmask 1041409   ;;  %s520_s4 = smov [#allocation14]  }
  0x14   :  { %120 = vst.msk [vmem:[#allocation3] sm:$0x3] %vm119_vm1, %v518_v27  ;;  %vm194_vm4 = vcmask 58368   ;;  %v519_v39 = vmov 0   ;;  %s314_s5 = sshll.u32 %s520_s4, 4  ;;  %s316_s24 = sshll.u32 %s621_s7, 4  ;;  %s315_s5 = int_to_ptr.vmem [resolvable:$true] %s314_s5  ;;  %s317_s24 = int_to_ptr.hbm [resolvable:$true] %s316_s24 }
  0x15   :  { %111 = vmatpush.bf16.msra.mxu0 %v350_v2  ;;  %151 = vmatpush.bf16.msra.mxu1 %v352_v3  ;;  %s521_s25 = smov [#allocation13]   ;;  %s305_s28 = sshll.u32 %s620_s6, 4  ;;  %s306_s28 = int_to_ptr.hbm [resolvable:$true] %s305_s28 }
  0x16   :  { %366 = vset.pattern.permute.xlu1 %v519_v39  ;;  %367 = vset.pattern.permute.xlu2 %v519_v39  ;;  %s303_s26 = sshll.u32 %s521_s25, 4  ;;  %s304_s26 = int_to_ptr.vmem [resolvable:$true] %s303_s26 }
  0x17   :  { %368 = vset.pattern.permute.xlu0 %v519_v39 }
  0x18   :  { %340 = vmatmul.msk.bf16.vlgmr.msra.gmra.mxu0 %vm100_vm0, %v83_v7  ;;  %349 = vmatmul.msk.bf16.vlgmr.msra.gmra.mxu1 %vm100_vm0, %v123_v8 }
  0x1b   :  { %v196_v40 = vld [vmem:[#allocation3] sm:$0x3] }
  0x95   :  { %v113_v10 = vpop.f32.mrf.mxu0  ;;  %v153_v11 = vpop.f32.mrf.mxu1 }
  0x96   :  { %118 = vst.msk [vmem:[#allocation2] sm:$0x3] %vm117_vm2, %v113_v10 }
  0x9d   :  { %v158_v12 = vld [vmem:[#allocation2] sm:$0x3]  ;;  %v115_v13 = vpop.f32.mrf.mxu0  ;;  %v155_v18 = vpop.f32.mrf.mxu1 }
  0x9e   :  { %v161_v14 = vperm.slane %v158_v12, 0  ;;  %v160_v15 = vrot.slane %v158_v12, 1  ;;  %v242_v12 = vld [vmem:[#allocation5] sm:$0x3] }
  0xa0   :  { %v165_v16 = vadd.f32 %v161_v14, %v153_v11  ;;  %v162_v17 = vperm.slane %v160_v15, 0 }
  0xa2   :  { %370 = vtanh.f32 %v165_v16  ;;  %v166_v19 = vadd.f32 %v162_v17, %v155_v18  ;;  %v218_v18 = vld [vmem:[#allocation4] sm:$0x3] }
  0xa4   :  { %372 = vtanh.f32 %v166_v19 }
  0xa8   :  { %v371_v21 = vpop.eup %370 }
  0xa9   :  { %v173_v22 = vmul.f32 %v371_v21, %v369_v20 }
  0xaa   :  { %v373_v24 = vpop.eup %372 }
  0xab   :  { %v175_v23 = vsel %vm100_vm0, %v173_v22, 0.0  ;;  %v174_v25 = vmul.f32 %v373_v24, %v369_v20 }
  0xac   :  { %176 = vadd.xlane.f32.xlu0 %v175_v23 }
  0xad   :  { %v178_v26 = vsel %vm100_vm0, %v174_v25, 0.0 }
  0xb4   :  { %179 = vadd.xlane.f32.xlu0 %v178_v26 }
 0x11f   :  { %v177_v28 = vpop.xlane.xlu0 %176 }
 0x120   :  { %v183_v32 = vadd.f32 %v182_v30, %v177_v28 }
 0x122   :  { %v189_v35 = vperm.slane %v183_v32, %v188_v31 }
 0x127   :  { %v180_v33 = vpop.xlane.xlu0 %179 }
 0x128   :  { %v184_v34 = vadd.f32 %v182_v30, %v180_v33 }
 0x12a   :  { %v190_v36 = vperm.slane %v184_v34, %v188_v31 }
 0x12c   :  { %v192_v37 = vsel %vm191_vm3, %v190_v36, %v189_v35 }
 0x12d   :  { %v197_v38 = vsel %vm194_vm4, %v192_v37, -inf  ;;  %195 = vst.msk [vmem:[#allocation14] sm:$0x3] %vm194_vm4, %v192_v37 }
 0x12e   :  { %198 = vmax.xlane.f32.xlu1 %v197_v38  ;;  %319 = dma.vmem_to_hbm [thread:$0]  %s315_s5, 32, %s317_s24, [#allocation15]  }
 0x1a1   :  { %v199_v41 = vpop.xlane.xlu1 %198 }
 0x1a2   :  { %v200_v42 = vmax.f32 %v196_v40, %v199_v41 }
 0x1a4   :  { %v201_v43 = vsub.f32 %v196_v40, %v200_v42  ;;  %270 = vst.msk [vmem:[#allocation3] sm:$0x3] %vm119_vm1, %v200_v42  ;;  %206 = vperm.xlu1 %366, %v200_v42  }
 0x1a6   :  { %v202_v52 = vmul.f32 1.442695, %v201_v43 }
 0x216   :  { %v207_v44 = vpop.permute.xlu1 %206 }
 0x217   :  { %v208_v45 = vperm.slane %v207_v44, 0  ;;  %v209_v46 = vperm.slane %v207_v44, 1 }
 0x219   :  { %v212_v47 = vsub.f32 %v183_v32, %v208_v45  ;;  %v213_v49 = vsub.f32 %v184_v34, %v209_v46 }
 0x21b   :  { %v214_v48 = vmul.f32 1.442695, %v212_v47  ;;  %v216_v50 = vmul.f32 1.442695, %v213_v49 }
 0x21d   :  { %374 = vpow2.f32 %v214_v48 }
 0x21e   :  { %376 = vpow2.f32 %v216_v50 }
 0x21f   :  { %378 = vpow2.f32 %v202_v52 }
 0x223   :  { %v375_v51 = vpop.eup %374 }
 0x224   :  { %223 = vperm.xlu2 %367, %v375_v51   ;;  %v377_v53 = vpop.eup %376 }
 0x225   :  { %v379_v54 = vpop.eup %378 }
 0x226   :  { %v219_v19 = vmul.f32 %v379_v54, %v218_v18 }
 0x22c   :  { %226 = vperm.xlu2 %367, %v377_v53  }
 0x234   :  { %245 = vperm.xlu2 %367, %v379_v54  }
 0x27e   :  { %v224_v55 = vpop.permute.xlu2 %223 }
 0x27f   :  { %v240_v56 = vmul.f32 %v224_v55, %v574_v5  ;;  %v228_v61 = vperm.slane %v224_v55, %v188_v31 }
 0x281   :  { %v249_v57 = vsel %vm100_vm0, %v240_v56, 0.0 }
 0x282   :  { %v250_v58 = vrot.slane %v249_v57, 4 }
 0x284   :  { %v251_v59 = vadd.f32 %v250_v58, %v249_v57 }
 0x286   :  { %v227_v60 = vpop.permute.xlu2 %226  ;;  %v252_v0 = vrot.slane %v251_v59, 2 }
 0x287   :  { %v229_v62 = vperm.slane %v227_v60, %v188_v31  ;;  %v241_v63 = vmul.f32 %v227_v60, %v576_v6 }
 0x288   :  { %v253_v7 = vadd.f32 %v252_v0, %v251_v59 }
 0x289   :  { %v256_v1 = vsel %vm100_vm0, %v241_v63, 0.0  ;;  %v230_v2 = vsel %vm191_vm3, %v229_v62, %v228_v61 }
 0x28a   :  { %v257_v3 = vrot.slane %v256_v1, 4  ;;  %v232_v4 = vsel %vm194_vm4, %v230_v2, 0.0  ;;  %v254_v9 = vrot.slane %v253_v7, 1 }
 0x28b   :  { %233 = vadd.xlane.f32.xlu0 %v232_v4 }
 0x28c   :  { %v258_v5 = vadd.f32 %v257_v3, %v256_v1  ;;  %v255_v14 = vadd.f32 %v254_v9, %v253_v7 }
 0x28e   :  { %v259_v8 = vrot.slane %v258_v5, 2  ;;  %v246_v13 = vpop.permute.xlu2 %245 }
 0x28f   :  { %v248_v6 = vmul.f32 %v246_v13, %v242_v12 }
 0x290   :  { %v260_v10 = vadd.f32 %v259_v8, %v258_v5 }
 0x292   :  { %v261_v11 = vrot.slane %v260_v10, 1 }
 0x294   :  { %v262_v15 = vadd.f32 %v261_v11, %v260_v10 }
 0x296   :  { %v265_v16 = vsel %vm191_vm3, %v262_v15, %v255_v14 }
 0x297   :  { %v267_v17 = vadd.f32 %v265_v16, %v248_v6 }
 0x299   :  { %269 = vst.msk [vmem:[#allocation5] sm:$0x3] %vm117_vm2, %v267_v17 }
 0x2a0   :  { %v290_v33 = vld [vmem:[#allocation5] sm:$0x3] }
 0x2fe   :  { %v234_v20 = vpop.xlane.xlu0 %233 }
 0x2ff   :  { %v235_v21 = vadd.f32 %v234_v20, %v219_v19 }
 0x301   :  { %237 = vst.msk [vmem:[#allocation4] sm:$0x3] %vm119_vm1, %v235_v21 }
 0x308   :  { %v274_v22 = vld [vmem:[#allocation4] sm:$0x3] }
 0x309   :  { %380 = vrcp.f32 %v274_v22  ;;  %v286_v26 = vand.u32 2147483648, %v274_v22  ;;  %v284_v28 = vand.u32 2147483647, %v274_v22  ;;  %vm280_vm6 = vweird.f32 %v274_v22 }
 0x30b   :  { %v287_v30 = vor.u32 1.1754944e-38, %v286_v26  ;;  %vm285_vm8 = vcmp.eq.f32.partialorder %v284_v28, 8.507059e+37 }
 0x30f   :  { %v381_v23 = vpop.eup %380 }
 0x310   :  { %v276_v24 = vmul.f32 %v381_v23, %v274_v22  ;;  %vm281_vm5 = vweird.f32 %v381_v23 }
 0x311   :  { %vm282_vm7 = vmor %vm280_vm6, %vm281_vm5 }
 0x312   :  { %v277_v25 = vsub.f32 1.0, %v276_v24 }
 0x314   :  { %v278_v27 = vmul.f32 %v381_v23, %v277_v25 }
 0x316   :  { %v279_v29 = vadd.f32 %v381_v23, %v278_v27 }
 0x318   :  { %v283_v31 = vsel %vm282_vm7, %v381_v23, %v279_v29 }
 0x319   :  { %v288_v32 = vsel %vm285_vm8, %v287_v30, %v283_v31 }
 0x31a   :  { %293 = vperm.xlu0 %368, %v288_v32  }
 0x38c   :  { %v294_v34 = vpop.permute.xlu0 %293 }
 0x38d   :  { %v296_v35 = vmul.f32 %v294_v34, %v290_v33 }
 0x38f   :  { %297 = vst.msk [vmem:[#allocation13] sm:$0x3] %vm117_vm2, %v296_v35 }
 0x390   :  { %308 = dma.vmem_to_hbm [thread:$0]  %s304_s26, 32, %s306_s28, [#allocation9]  }
 0x391   :  { %506 = dma.done.wait [#allocation9], 32  }
 0x392   :  { %507 = vsyncadd [#allocation9], 4294967264 }
 0x393   :  { %508 = dma.done.wait [#allocation15], 32  }
 0x394   :  { %509 = vsyncadd [#allocation15], 4294967264 }
 0x395   :  { %328 = vsyncpa [#allocation8], 1 }
 0x396   :  { %329 = vsyncpa [#allocation11], 1 }
 0x397   :  { %330 = vsyncpa [#allocation9], 1 }
 0x398   :  { %331 = vsyncpa [#allocation15], 1 }

</bundles_post_ra>
